<compile_context>
chip_gen: v6e
topology: v6e:2x2x1
jax: 0.10.0
libtpu: 0.0.40
codegen_flags: <defaults>
</compile_context>

<pallas_src>
import functools

import jax
import jax.numpy as jnp
from jax.experimental import pallas as pl
from jax.experimental.pallas import tpu as pltpu


HIDDEN = 256
NUM_SWITCH_ACTIONS = 2
OUT_PAD = 128          # lane-padded width of the fused output head
MAX_TILE_B = 256       # rows per grid step for large batches


def _round_up(n, m):
    return ((n + m - 1) // m) * m


# ----------------------------------------------------------------------------
# Pallas kernels
# ----------------------------------------------------------------------------
def _switch_kernel_plain(x_ref, w1_ref, wh_ref, wo_ref, b_ref, out_ref):
    bdt = jnp.bfloat16
    x = x_ref[...]                      # bf16 [tb, in]
    b = b_ref[...]                      # f32  [8, 256]

    h = jnp.dot(x, w1_ref[...], preferred_element_type=jnp.float32) + b[0:1, :]
    h = jnp.maximum(h, 0.0).astype(bdt)
    h = jnp.maximum(jnp.dot(h, wh_ref[0], preferred_element_type=jnp.float32)
                    + b[1:2, :], 0.0).astype(bdt)
    h = jnp.maximum(jnp.dot(h, wh_ref[1], preferred_element_type=jnp.float32)
                    + b[2:3, :], 0.0).astype(bdt)
    # lane-padded output head [256, 128]; q lives in lanes 0..1
    o = jnp.dot(h, wo_ref[...], preferred_element_type=jnp.float32) + b[3:4, :OUT_PAD]
    out_ref[...] = o[:, :NUM_SWITCH_ACTIONS].astype(out_ref.dtype)


def _switch_kernel_dueling(x_ref, w1_ref, wh_ref, wo_ref, b_ref, out_ref):
    bdt = jnp.bfloat16
    x = x_ref[...]                      # bf16 [tb, in]
    b = b_ref[...]                      # f32  [8, 512]

    # layer 1: Q and V first layers fused -> one [tb, in] x [in, 512] matmul
    h = jnp.dot(x, w1_ref[...], preferred_element_type=jnp.float32) + b[0:1, :]
    h = jnp.maximum(h, 0.0).astype(bdt)
    hq = h[:, :HIDDEN]
    hv = h[:, HIDDEN:]

    # Q branch layers 2, 3
    hq = jnp.maximum(jnp.dot(hq, wh_ref[0], preferred_element_type=jnp.float32)
                     + b[1:2, :HIDDEN], 0.0).astype(bdt)
    hq = jnp.maximum(jnp.dot(hq, wh_ref[1], preferred_element_type=jnp.float32)
                     + b[2:3, :HIDDEN], 0.0).astype(bdt)
    # V branch layers 2, 3
    hv = jnp.maximum(jnp.dot(hv, wh_ref[2], preferred_element_type=jnp.float32)
                     + b[3:4, :HIDDEN], 0.0).astype(bdt)
    hv = jnp.maximum(jnp.dot(hv, wh_ref[3], preferred_element_type=jnp.float32)
                     + b[4:5, :HIDDEN], 0.0).astype(bdt)

    # fused output heads: block-diagonal [512, 128] weight.
    # lanes 0..1 = q_out(hq), lane 2 = v_out(hv).
    hcat = jnp.concatenate([hq, hv], axis=1)                       # [tb, 512]
    o = jnp.dot(hcat, wo_ref[...], preferred_element_type=jnp.float32) \
        + b[5:6, :OUT_PAD]
    q = o[:, :NUM_SWITCH_ACTIONS]
    v = o[:, NUM_SWITCH_ACTIONS:NUM_SWITCH_ACTIONS + 1]
    q_mean = jnp.mean(q, axis=1, keepdims=True)
    out_ref[...] = (v + (q - q_mean)).astype(out_ref.dtype)


# ----------------------------------------------------------------------------
# Parameter init (PyTorch-Linear-style uniform fan-in init)
# ----------------------------------------------------------------------------
def _init_linear(key, in_dim, out_dim, dtype=jnp.float32):
    kw, kb = jax.random.split(key)
    bound = 1.0 / jnp.sqrt(jnp.asarray(in_dim, dtype))
    w = jax.random.uniform(kw, (in_dim, out_dim), dtype, -bound, bound)  # [in, out]
    b = jax.random.uniform(kb, (1, out_dim), dtype, -bound, bound)
    return w, b


def init_switch_params(key, input_dim, dueling):
    keys = jax.random.split(key, 8)
    params = {}
    params["fc1"] = _init_linear(keys[0], input_dim, HIDDEN)
    params["fc2"] = _init_linear(keys[1], HIDDEN, HIDDEN)
    params["fc3"] = _init_linear(keys[2], HIDDEN, HIDDEN)
    params["q_out"] = _init_linear(keys[3], HIDDEN, NUM_SWITCH_ACTIONS)
    if dueling:
        params["v_fc1"] = _init_linear(keys[4], input_dim, HIDDEN)
        params["v_fc2"] = _init_linear(keys[5], HIDDEN, HIDDEN)
        params["v_fc3"] = _init_linear(keys[6], HIDDEN, HIDDEN)
        params["v_out"] = _init_linear(keys[7], HIDDEN, 1)
    return params


def pack_switch_params(params, dueling):
    """Pack per-layer params into 4 kernel arrays (bf16 weights, f32 biases).

    Do this once per parameter update (outside the forward hot path)."""
    wdt = jnp.bfloat16
    if dueling:
        # fused first layer: [in, 512]
        w1 = jnp.concatenate([params["fc1"][0], params["v_fc1"][0]], axis=1).astype(wdt)
        # hidden slab: [4, 256, 256] = (fc2, fc3, v_fc2, v_fc3)
        wh = jnp.stack([params["fc2"][0], params["fc3"][0],
                        params["v_fc2"][0], params["v_fc3"][0]]).astype(wdt)
        # block-diagonal fused output head: [512, 128]
        wo = jnp.zeros((2 * HIDDEN, OUT_PAD), jnp.float32)
        wo = wo.at[:HIDDEN, :NUM_SWITCH_ACTIONS].set(params["q_out"][0])
        wo = wo.at[HIDDEN:, NUM_SWITCH_ACTIONS:NUM_SWITCH_ACTIONS + 1].set(
            params["v_out"][0])
        wo = wo.astype(wdt)
        # bias slab: [8, 512]
        b = jnp.zeros((8, 2 * HIDDEN), jnp.float32)
        b = b.at[0, :].set(jnp.concatenate([params["fc1"][1][0],
                                            params["v_fc1"][1][0]]))
        b = b.at[1, :HIDDEN].set(params["fc2"][1][0])
        b = b.at[2, :HIDDEN].set(params["fc3"][1][0])
        b = b.at[3, :HIDDEN].set(params["v_fc2"][1][0])
        b = b.at[4, :HIDDEN].set(params["v_fc3"][1][0])
        b = b.at[5, :NUM_SWITCH_ACTIONS].set(params["q_out"][1][0])
        b = b.at[5, NUM_SWITCH_ACTIONS].set(params["v_out"][1][0, 0])
    else:
        w1 = params["fc1"][0].astype(wdt)                               # [in, 256]
        wh = jnp.stack([params["fc2"][0], params["fc3"][0]]).astype(wdt)  # [2,256,256]
        wo = jnp.zeros((HIDDEN, OUT_PAD), jnp.float32)
        wo = wo.at[:, :NUM_SWITCH_ACTIONS].set(params["q_out"][0]).astype(wdt)
        b = jnp.zeros((8, HIDDEN), jnp.float32)
        b = b.at[0, :].set(params["fc1"][1][0])
        b = b.at[1, :].set(params["fc2"][1][0])
        b = b.at[2, :].set(params["fc3"][1][0])
        b = b.at[3, :NUM_SWITCH_ACTIONS].set(params["q_out"][1][0])
    return {"w1": w1, "wh": wh, "wo": wo, "b": b}


# ----------------------------------------------------------------------------
# Wrapper
# ----------------------------------------------------------------------------
@functools.partial(jax.jit, static_argnames=("dueling",))
def switch_forward(x, packed, *, dueling):
    """Pallas forward pass. x: [batch, obs+goal] f32 -> [batch, 2] f32."""
    batch, input_dim = x.shape
    xb = x.astype(jnp.bfloat16)

    # batch tiling: one tile for small batch, 256-row tiles (parallel) otherwise
    if batch <= MAX_TILE_B:
        tile_b = _round_up(batch, 8)
    else:
        tile_b = MAX_TILE_B
    padded = _round_up(batch, tile_b)
    if padded != batch:
        xb = jnp.pad(xb, ((0, padded - batch), (0, 0)))
    grid = (padded // tile_b,)

    w1, wh, wo, b = packed["w1"], packed["wh"], packed["wo"], packed["b"]
    kernel = _switch_kernel_dueling if dueling else _switch_kernel_plain

    out = pl.pallas_call(
        kernel,
        out_shape=jax.ShapeDtypeStruct((padded, NUM_SWITCH_ACTIONS), jnp.float32),
        grid_spec=pltpu.PrefetchScalarGridSpec(
            num_scalar_prefetch=0,
            grid=grid,
            in_specs=[
                pl.BlockSpec((tile_b, input_dim), lambda i: (i, 0)),   # x tile
                pl.BlockSpec(w1.shape, lambda i: (0, 0)),              # resident
                pl.BlockSpec(wh.shape, lambda i: (0, 0, 0)),           # resident
                pl.BlockSpec(wo.shape, lambda i: (0, 0)),              # resident
                pl.BlockSpec(b.shape, lambda i: (0, 0)),               # resident
            ],
            out_specs=pl.BlockSpec((tile_b, NUM_SWITCH_ACTIONS), lambda i: (i, 0)),
        ),
        compiler_params=pltpu.CompilerParams(
            dimension_semantics=("parallel",),
            vmem_limit_bytes=8 * 1024 * 1024,
        ),
    )(xb, w1, wh, wo, b)
    return out[:batch]


# ----------------------------------------------------------------------------
# Pure-JAX reference (mirrors the PyTorch forward; bf16 weights/activations,
# f32 accumulation, matching the kernel's numerics)
# ----------------------------------------------------------------------------
def switch_reference(x, params, dueling):
    def lin(p, h):
        w, b = p
        return jnp.dot(h.astype(jnp.bfloat16), w.astype(jnp.bfloat16),
                       preferred_element_type=jnp.float32) + b

    q = jax.nn.relu(lin(params["fc1"], x))
    q = jax.nn.relu(lin(params["fc2"], q))
    q = jax.nn.relu(lin(params["fc3"], q))
    q = lin(params["q_out"], q)
    if dueling:
        v = jax.nn.relu(lin(params["v_fc1"], x))
        v = jax.nn.relu(lin(params["v_fc2"], v))
        v = jax.nn.relu(lin(params["v_fc3"], v))
        v = lin(params["v_out"], v)
        q_mean = jnp.mean(q, axis=1, keepdims=True)
        q = v + (q - q_mean)
    return q


# ----------------------------------------------------------------------------
if __name__ == "__main__":
    OBS, GOAL = 16, 8
    INPUT_DIM = OBS + GOAL

    key = jax.random.PRNGKey(0)
    kx, kx2, kp = jax.random.split(key, 3)

    ok = True
    # small batch (single grid step), both dueling modes
    x_small = jax.random.normal(kx, (8, INPUT_DIM), jnp.float32)
    for dueling in (True, False):
        params = init_switch_params(kp, INPUT_DIM, dueling)
        packed = pack_switch_params(params, dueling)
        out = jax.block_until_ready(switch_forward(x_small, packed, dueling=dueling))
        ref = switch_reference(x_small, params, dueling)
        if out.shape != (8, NUM_SWITCH_ACTIONS):
            ok = False
        if not jnp.allclose(out, ref, atol=1e-2, rtol=1e-2):
            ok = False

    # larger batch exercising the batch grid + padding path (dueling)
    x_big = jax.random.normal(kx2, (384, INPUT_DIM), jnp.float32)
    params = init_switch_params(kp, INPUT_DIM, True)
    packed = pack_switch_params(params, True)
    out = jax.block_until_ready(switch_forward(x_big, packed, dueling=True))
    ref = switch_reference(x_big, params, True)
    if out.shape != (384, NUM_SWITCH_ACTIONS):
        ok = False
    if not jnp.allclose(out, ref, atol=1e-2, rtol=1e-2):
        ok = False

    print("KERNEL_OK" if ok else "KERNEL_MISMATCH")
</pallas_src>

<mosaic_0001>
module attributes {stable_mosaic.version = 11 : i64} {
  func.func @_switch_kernel_dueling(%arg0: i32, %arg1: memref<8x24xbf16, #tpu.memory_space<vmem>>, %arg2: memref<24x512xbf16, #tpu.memory_space<vmem>>, %arg3: memref<4x256x256xbf16, #tpu.memory_space<vmem>>, %arg4: memref<512x128xbf16, #tpu.memory_space<vmem>>, %arg5: memref<8x512xf32, #tpu.memory_space<vmem>>, %arg6: memref<8x2xf32, #tpu.memory_space<vmem>>) attributes {dimension_semantics = [#tpu.dimension_semantics<parallel>], iteration_bounds = array<i64: 1>, scalar_prefetch = 0 : i64, scratch_operands = 0 : i64, tpu.core_type = #tpu.core_type<tc>, window_params = [{transform_indices = @transform_0, window_bounds = array<i64: 8, 24>}, {pipeline_mode = #tpu.pipeline_mode<synchronous>, transform_indices = @transform_1, window_bounds = array<i64: 24, 512>}, {pipeline_mode = #tpu.pipeline_mode<synchronous>, transform_indices = @transform_2, window_bounds = array<i64: 4, 256, 256>}, {pipeline_mode = #tpu.pipeline_mode<synchronous>, transform_indices = @transform_3, window_bounds = array<i64: 512, 128>}, {pipeline_mode = #tpu.pipeline_mode<synchronous>, transform_indices = @transform_4, window_bounds = array<i64: 8, 512>}, {transform_indices = @transform_5, window_bounds = array<i64: 8, 2>}]} {
    %c0 = arith.constant 0 : index
    %c0_0 = arith.constant 0 : index
    %0 = vector.load %arg1[%c0, %c0_0] : memref<8x24xbf16, #tpu.memory_space<vmem>>, vector<8x24xbf16>
    %c0_1 = arith.constant 0 : index
    %c0_2 = arith.constant 0 : index
    %1 = vector.load %arg5[%c0_1, %c0_2] : memref<8x512xf32, #tpu.memory_space<vmem>>, vector<8x512xf32>
    %c0_3 = arith.constant 0 : index
    %c0_4 = arith.constant 0 : index
    %2 = vector.load %arg2[%c0_3, %c0_4] : memref<24x512xbf16, #tpu.memory_space<vmem>>, vector<24x512xbf16>
    %cst = arith.constant dense<0.000000e+00> : vector<8x512xf32>
    %3 = tpu.matmul %0, %2, %cst {dimension_numbers = #tpu.dot_dimension_numbers<[1], [0], [0], [1], [0, 0, 1, 1], [], []>} : vector<8x24xbf16>, vector<24x512xbf16>, vector<8x512xf32> -> vector<8x512xf32>
    %4 = vector.extract_strided_slice %1 {offsets = [0, 0], sizes = [1, 512], strides = [1, 1]} : vector<8x512xf32> to vector<1x512xf32>
    %5 = vector.broadcast %4 : vector<1x512xf32> to vector<8x512xf32>
    %6 = arith.addf %3, %5 : vector<8x512xf32>
    %cst_5 = arith.constant 0.000000e+00 : f32
    %7 = vector.broadcast %cst_5 : f32 to vector<8x512xf32>
    %8 = arith.maximumf %6, %7 : vector<8x512xf32>
    %9 = arith.truncf %8 : vector<8x512xf32> to vector<8x512xbf16>
    %10 = vector.extract_strided_slice %9 {offsets = [0, 0], sizes = [8, 256], strides = [1, 1]} : vector<8x512xbf16> to vector<8x256xbf16>
    %11 = vector.extract_strided_slice %9 {offsets = [0, 256], sizes = [8, 256], strides = [1, 1]} : vector<8x512xbf16> to vector<8x256xbf16>
    %c0_6 = arith.constant 0 : index
    %c0_7 = arith.constant 0 : index
    %c0_8 = arith.constant 0 : index
    %12 = vector.load %arg3[%c0_6, %c0_7, %c0_8] : memref<4x256x256xbf16, #tpu.memory_space<vmem>>, vector<1x256x256xbf16>
    %13 = vector.shape_cast %12 : vector<1x256x256xbf16> to vector<256x256xbf16>
    %cst_9 = arith.constant dense<0.000000e+00> : vector<8x256xf32>
    %14 = tpu.matmul %10, %13, %cst_9 {dimension_numbers = #tpu.dot_dimension_numbers<[1], [0], [0], [1], [0, 0, 1, 1], [], []>} : vector<8x256xbf16>, vector<256x256xbf16>, vector<8x256xf32> -> vector<8x256xf32>
    %15 = vector.extract_strided_slice %1 {offsets = [1, 0], sizes = [1, 256], strides = [1, 1]} : vector<8x512xf32> to vector<1x256xf32>
    %16 = vector.broadcast %15 : vector<1x256xf32> to vector<8x256xf32>
    %17 = arith.addf %14, %16 : vector<8x256xf32>
    %cst_10 = arith.constant 0.000000e+00 : f32
    %18 = vector.broadcast %cst_10 : f32 to vector<8x256xf32>
    %19 = arith.maximumf %17, %18 : vector<8x256xf32>
    %20 = arith.truncf %19 : vector<8x256xf32> to vector<8x256xbf16>
    %c1 = arith.constant 1 : index
    %c0_11 = arith.constant 0 : index
    %c0_12 = arith.constant 0 : index
    %21 = vector.load %arg3[%c1, %c0_11, %c0_12] : memref<4x256x256xbf16, #tpu.memory_space<vmem>>, vector<1x256x256xbf16>
    %22 = vector.shape_cast %21 : vector<1x256x256xbf16> to vector<256x256xbf16>
    %cst_13 = arith.constant dense<0.000000e+00> : vector<8x256xf32>
    %23 = tpu.matmul %20, %22, %cst_13 {dimension_numbers = #tpu.dot_dimension_numbers<[1], [0], [0], [1], [0, 0, 1, 1], [], []>} : vector<8x256xbf16>, vector<256x256xbf16>, vector<8x256xf32> -> vector<8x256xf32>
    %24 = vector.extract_strided_slice %1 {offsets = [2, 0], sizes = [1, 256], strides = [1, 1]} : vector<8x512xf32> to vector<1x256xf32>
    %25 = vector.broadcast %24 : vector<1x256xf32> to vector<8x256xf32>
    %26 = arith.addf %23, %25 : vector<8x256xf32>
    %cst_14 = arith.constant 0.000000e+00 : f32
    %27 = vector.broadcast %cst_14 : f32 to vector<8x256xf32>
    %28 = arith.maximumf %26, %27 : vector<8x256xf32>
    %29 = arith.truncf %28 : vector<8x256xf32> to vector<8x256xbf16>
    %c2 = arith.constant 2 : index
    %c0_15 = arith.constant 0 : index
    %c0_16 = arith.constant 0 : index
    %30 = vector.load %arg3[%c2, %c0_15, %c0_16] : memref<4x256x256xbf16, #tpu.memory_space<vmem>>, vector<1x256x256xbf16>
    %31 = vector.shape_cast %30 : vector<1x256x256xbf16> to vector<256x256xbf16>
    %cst_17 = arith.constant dense<0.000000e+00> : vector<8x256xf32>
    %32 = tpu.matmul %11, %31, %cst_17 {dimension_numbers = #tpu.dot_dimension_numbers<[1], [0], [0], [1], [0, 0, 1, 1], [], []>} : vector<8x256xbf16>, vector<256x256xbf16>, vector<8x256xf32> -> vector<8x256xf32>
    %33 = vector.extract_strided_slice %1 {offsets = [3, 0], sizes = [1, 256], strides = [1, 1]} : vector<8x512xf32> to vector<1x256xf32>
    %34 = vector.broadcast %33 : vector<1x256xf32> to vector<8x256xf32>
    %35 = arith.addf %32, %34 : vector<8x256xf32>
    %cst_18 = arith.constant 0.000000e+00 : f32
    %36 = vector.broadcast %cst_18 : f32 to vector<8x256xf32>
    %37 = arith.maximumf %35, %36 : vector<8x256xf32>
    %38 = arith.truncf %37 : vector<8x256xf32> to vector<8x256xbf16>
    %c3 = arith.constant 3 : index
    %c0_19 = arith.constant 0 : index
    %c0_20 = arith.constant 0 : index
    %39 = vector.load %arg3[%c3, %c0_19, %c0_20] : memref<4x256x256xbf16, #tpu.memory_space<vmem>>, vector<1x256x256xbf16>
    %40 = vector.shape_cast %39 : vector<1x256x256xbf16> to vector<256x256xbf16>
    %cst_21 = arith.constant dense<0.000000e+00> : vector<8x256xf32>
    %41 = tpu.matmul %38, %40, %cst_21 {dimension_numbers = #tpu.dot_dimension_numbers<[1], [0], [0], [1], [0, 0, 1, 1], [], []>} : vector<8x256xbf16>, vector<256x256xbf16>, vector<8x256xf32> -> vector<8x256xf32>
    %42 = vector.extract_strided_slice %1 {offsets = [4, 0], sizes = [1, 256], strides = [1, 1]} : vector<8x512xf32> to vector<1x256xf32>
    %43 = vector.broadcast %42 : vector<1x256xf32> to vector<8x256xf32>
    %44 = arith.addf %41, %43 : vector<8x256xf32>
    %cst_22 = arith.constant 0.000000e+00 : f32
    %45 = vector.broadcast %cst_22 : f32 to vector<8x256xf32>
    %46 = arith.maximumf %44, %45 : vector<8x256xf32>
    %47 = arith.truncf %46 : vector<8x256xf32> to vector<8x256xbf16>
    %48 = tpu.concatenate %29, %47 in 1 : vector<8x256xbf16>, vector<8x256xbf16> -> vector<8x512xbf16>
    %c0_23 = arith.constant 0 : index
    %c0_24 = arith.constant 0 : index
    %49 = vector.load %arg4[%c0_23, %c0_24] : memref<512x128xbf16, #tpu.memory_space<vmem>>, vector<512x128xbf16>
    %cst_25 = arith.constant dense<0.000000e+00> : vector<8x128xf32>
    %50 = tpu.matmul %48, %49, %cst_25 {dimension_numbers = #tpu.dot_dimension_numbers<[1], [0], [0], [1], [0, 0, 1, 1], [], []>} : vector<8x512xbf16>, vector<512x128xbf16>, vector<8x128xf32> -> vector<8x128xf32>
    %51 = vector.extract_strided_slice %1 {offsets = [5, 0], sizes = [1, 128], strides = [1, 1]} : vector<8x512xf32> to vector<1x128xf32>
    %52 = vector.broadcast %51 : vector<1x128xf32> to vector<8x128xf32>
    %53 = arith.addf %50, %52 : vector<8x128xf32>
    %54 = vector.extract_strided_slice %53 {offsets = [0, 0], sizes = [8, 2], strides = [1, 1]} : vector<8x128xf32> to vector<8x2xf32>
    %55 = vector.extract_strided_slice %53 {offsets = [0, 2], sizes = [8, 1], strides = [1, 1]} : vector<8x128xf32> to vector<8x1xf32>
    %cst_26 = arith.constant dense<0.000000e+00> : vector<8xf32>
    %56 = vector.multi_reduction <add>, %54, %cst_26 [1] : vector<8x2xf32> to vector<8xf32>
    %57 = vector.shape_cast %56 : vector<8xf32> to vector<8x1xf32>
    %cst_27 = arith.constant 2.000000e+00 : f32
    %58 = vector.broadcast %cst_27 : f32 to vector<8x1xf32>
    %59 = arith.divf %57, %58 : vector<8x1xf32>
    %60 = vector.broadcast %59 : vector<8x1xf32> to vector<8x2xf32>
    %61 = arith.subf %54, %60 : vector<8x2xf32>
    %62 = vector.broadcast %55 : vector<8x1xf32> to vector<8x2xf32>
    %63 = arith.addf %62, %61 : vector<8x2xf32>
    %c0_28 = arith.constant 0 : index
    %c0_29 = arith.constant 0 : index
    %64 = vector.load %arg6[%c0_28, %c0_29] : memref<8x2xf32, #tpu.memory_space<vmem>>, vector<8x2xf32>
    tpu.vector_store %arg6[%c0_28, %c0_29], %63 {strides = array<i32>} : memref<8x2xf32, #tpu.memory_space<vmem>>, vector<8x2xf32>,
    return
  }
  func.func @transform_0(%arg0: i32) -> (i32, i32) {
    %c0_i32 = arith.constant 0 : i32
    %c0_i32_0 = arith.constant 0 : i32
    return %arg0, %c0_i32 : i32, i32
  }
  func.func @transform_1(%arg0: i32) -> (i32, i32) {
    %c0_i32 = arith.constant 0 : i32
    %c0_i32_0 = arith.constant 0 : i32
    %c0_i32_1 = arith.constant 0 : i32
    return %c0_i32, %c0_i32_0 : i32, i32
  }
  func.func @transform_2(%arg0: i32) -> (i32, i32, i32) {
    %c0_i32 = arith.constant 0 : i32
    %c0_i32_0 = arith.constant 0 : i32
    %c0_i32_1 = arith.constant 0 : i32
    %c0_i32_2 = arith.constant 0 : i32
    return %c0_i32, %c0_i32_0, %c0_i32_1 : i32, i32, i32
  }
  func.func @transform_3(%arg0: i32) -> (i32, i32) {
    %c0_i32 = arith.constant 0 : i32
    %c0_i32_0 = arith.constant 0 : i32
    %c0_i32_1 = arith.constant 0 : i32
    return %c0_i32, %c0_i32_0 : i32, i32
  }
  func.func @transform_4(%arg0: i32) -> (i32, i32) {
    %c0_i32 = arith.constant 0 : i32
    %c0_i32_0 = arith.constant 0 : i32
    %c0_i32_1 = arith.constant 0 : i32
    return %c0_i32, %c0_i32_0 : i32, i32
  }
  func.func @transform_5(%arg0: i32) -> (i32, i32) {
    %c0_i32 = arith.constant 0 : i32
    %c0_i32_0 = arith.constant 0 : i32
    return %arg0, %c0_i32 : i32, i32
  }
}

</mosaic_0001>

<bundles_post_ra>
// kernel: switch_forward.1
= control target key start
LH: loop header
LB: loop body
LE: loop exit
PB: predicated region body
PF: predicated region fallthrough
CT: control target
= control target key end

     0   :  { %10 = vsyncpa [#allocation3], 0  ;;  %s2223_s0 = inlined_call_operand.vmem [shape: bf16[8,24], index: 0, kind: input, shape index: {}]   ;;  %s2224_s1 = inlined_call_operand.hbm [shape: bf16[24,512], index: 1, kind: input, shape index: {}]   ;;  %s2225_s2 = inlined_call_operand.hbm [shape: bf16[4,256,256], index: 2, kind: input, shape index: {}]   ;;  %s2226_s3 = inlined_call_operand.hbm [shape: bf16[512,128], index: 3, kind: input, shape index: {}]   ;;  %s2227_s4 = inlined_call_operand.hbm [shape: f32[8,512], index: 4, kind: input, shape index: {}]   ;;  %s2228_s5 = inlined_call_operand.vmem [shape: f32[8,2], index: 5, kind: output, shape index: {}]  }
   0x1   :  { %11 = vsyncpa [#allocation5], 0 }
   0x2   :  { %12 = vsyncpa [#allocation8], 0  ;;  %s2131_s18 = smov [#allocation4]  }
   0x3   :  { %s32_s19 = sshll.u32 %s2131_s18, 4  ;;  %s33_s19 = int_to_ptr.vmem [resolvable:$true] %s32_s19 }
   0x4   :  { %s2053_s20 = scalar_lea.vmem %s33_s19, 16384  ;;  %p2058_p1 = scmp.lt.s32.totalorder %s33_s19, %s33_s19 }
   0x5   :  { %p2054_p0 = scmp.ne.s32.totalorder %s33_s19, %s2053_s20  ;;  %p2059_p2 = scmp.lt.s32.totalorder %s2053_s20, %s2053_s20 }
   0x7   :  { %p2060_p3 = por %p2059_p2, %p2058_p1 }
   0x9   :  { %p2061_p4 = pnand %p2060_p3, %p2054_p0 }
   0xb   :  { %2064 = shalt.err (!%p2061_p4)
}
   0xc   :  { %s2132_s21 = smov 128   ;;  %s2133_s22 = smov 8  }
   0xd   :  { %38 = dma.hbm_to_vmem [thread:$0]  %s2225_s2, 16384, %s33_s19, [#allocation5], %s2132_s21, %s2132_s21, %s2133_s22  }
   0xe   :  { %s2134_s25 = smov [#allocation2]  }
   0xf   :  { %s20_s26 = sshll.u32 %s2134_s25, 4  ;;  %s21_s26 = int_to_ptr.vmem [resolvable:$true] %s20_s26 }
  0x10   :  { %s2073_s27 = scalar_lea.vmem %s21_s26, 768  ;;  %p2078_p6 = scmp.lt.s32.totalorder %s21_s26, %s21_s26 }
  0x11   :  { %p2074_p5 = scmp.ne.s32.totalorder %s21_s26, %s2073_s27  ;;  %p2079_p7 = scmp.lt.s32.totalorder %s2073_s27, %s2073_s27 }
  0x13   :  { %p2080_p8 = por %p2079_p7, %p2078_p6 }
  0x15   :  { %p2081_p9 = pnand %p2080_p8, %p2074_p5 }
  0x17   :  { %2084 = shalt.err (!%p2081_p9)
}
  0x18   :  { %s2135_s28 = smov 256   ;;  %s2136_s29 = smov 16  }
  0x19   :  { %26 = dma.hbm_to_vmem [thread:$0]  %s2224_s1, 768, %s21_s26, [#allocation3], %s2135_s28, %s2135_s28, %s2136_s29  }
  0x1a   :  { %s2137_s7 = smov [#allocation6]  }
  0x1b   :  { %s44_s8 = sshll.u32 %s2137_s7, 4  ;;  %s45_s8 = int_to_ptr.vmem [resolvable:$true] %s44_s8 }
  0x1c   :  { %s2093_s2 = scalar_lea.vmem %s45_s8, 4096  ;;  %p2098_p11 = scmp.lt.s32.totalorder %s45_s8, %s45_s8 }
  0x1d   :  { %p2094_p10 = scmp.ne.s32.totalorder %s45_s8, %s2093_s2  ;;  %p2099_p12 = scmp.lt.s32.totalorder %s2093_s2, %s2093_s2 }
  0x1f   :  { %p2100_p13 = por %p2099_p12, %p2098_p11 }
  0x21   :  { %p2101_p0 = pnand %p2100_p13, %p2094_p10 }
  0x23   :  { %2104 = shalt.err (!%p2101_p0)
}
  0x24   :  { %s2138_s9 = smov 64   ;;  %s2139_s10 = smov 4  }
  0x25   :  { %50 = dma.hbm_to_vmem [thread:$0]  %s2226_s3, 4096, %s45_s8, [#allocation5], %s2138_s9, %s2138_s9, %s2139_s10  }
  0x26   :  { %s2140_s13 = smov [#allocation7]  }
  0x27   :  { %s57_s14 = sshll.u32 %s2140_s13, 4  ;;  %s58_s14 = int_to_ptr.vmem [resolvable:$true] %s57_s14 }
  0x28   :  { %s2113_s1 = scalar_lea.vmem %s58_s14, 512  ;;  %p2118_p2 = scmp.lt.s32.totalorder %s58_s14, %s58_s14 }
  0x29   :  { %p2114_p1 = scmp.ne.s32.totalorder %s58_s14, %s2113_s1  ;;  %p2119_p3 = scmp.lt.s32.totalorder %s2113_s1, %s2113_s1 }
  0x2b   :  { %p2120_p4 = por %p2119_p3, %p2118_p2 }
  0x2d   :  { %p2121_p5 = pnand %p2120_p4, %p2114_p1 }
  0x2f   :  { %2124 = shalt.err (!%p2121_p5)
}
  0x30   :  { %60 = dma.hbm_to_vmem [thread:$0]  %s2227_s4, 512, %s58_s14, [#allocation8]  }
  0x31   :  { %2125 = dma.done.wait [#allocation3], 768  }
  0x32   :  { %2126 = vsyncadd [#allocation3], 4294966528 }
  0x33   :  { %2127 = dma.done.wait [#allocation5], 20480  }
  0x34   :  { %2128 = vsyncadd [#allocation5], 4294946816 }
  0x35   :  { %2129 = dma.done.wait [#allocation8], 512  }
  0x36   :  { %2130 = vsyncadd [#allocation8], 4294966784  ;;  %v2141_v0 = vmov 0   ;;  %v83_v1 = vld [vmem:[#allocation2 + $0x20] sm:$0xff]  ;;  %vm135_vm0 = vcmask 1043456   ;;  %v84_v5 = vld [vmem:[#allocation2 + $0x28] sm:$0xff] }
  0x37   :  { %180 = vmatprep.mubr.bf16.mxu0 %v2141_v0  ;;  %221 = vmatprep.mubr.bf16.mxu1 %v2141_v0  ;;  %v1587_v2 = vcombine.high %v83_v1, %v83_v1  ;;  %v1586_v3 = vcombine.low %v83_v1, %v83_v1  ;;  %v1813_v4 = vld [vmem:[#allocation2 + $0x4] ss:$16 sps:$4 sm:$0xff]   ;;  %v1589_v7 = vcombine.high %v84_v5, %v84_v5  ;;  %v1818_v9 = vld [vmem:[#allocation2 + $0xc] ss:$16 sps:$4 sm:$0xff]   ;;  %v1815_v10 = vld [vmem:[#allocation2] ss:$16 sps:$4 sm:$0xff]  }
  0x38   :  { %v1588_v8 = vcombine.low %v84_v5, %v84_v5  ;;  %v1823_v12 = vld [vmem:[#allocation4 + $0x74] ss:$8 sps:$4 sm:$0xff]   ;;  %v1820_v13 = vld [vmem:[#allocation2 + $0x8] ss:$16 sps:$4 sm:$0xff]   ;;  %v74_v14 = vld [vmem:[%s2223_s0] sm:$0xf] }
  0x39   :  { %1590 = vmatprep.subr.msk.bf16.mxu0 %vm135_vm0, %v1587_v2  ;;  %v137_v6 = vsel %vm135_vm0, %v1586_v3, 0  ;;  %1592 = vmatprep.subr.msk.bf16.mxu1 %vm135_vm0, %v1589_v7  ;;  %vm131_vm1 = vcmask 195584   ;;  %v1821_v15 = vld [vmem:[#allocation4 + $0x70] ss:$8 sps:$4 sm:$0xff]   ;;  %v1826_v16 = vld [vmem:[#allocation4 + $0x64] ss:$8 sps:$4 sm:$0xff]  }
  0x3a   :  { %161 = vmatpush1.bf16.msra.mxu0 %v137_v6  ;;  %v143_v11 = vsel %vm135_vm0, %v1588_v8, 0  ;;  %v1824_v17 = vld [vmem:[#allocation4 + $0x60] ss:$8 sps:$4 sm:$0xff]   ;;  %v1829_v18 = vld [vmem:[#allocation4 + $0x54] ss:$8 sps:$4 sm:$0xff]   ;;  %vm1561_vm2 = vcmask 15360  }
  0x3b   :  { %162 = vmatprep.subr.bf16.mxu0 %v1813_v4  ;;  %202 = vmatpush1.bf16.msra.mxu1 %v143_v11  ;;  %v1827_v19 = vld [vmem:[#allocation4 + $0x50] ss:$8 sps:$4 sm:$0xff]   ;;  %v1832_v20 = vld [vmem:[#allocation4 + $0x44] ss:$8 sps:$4 sm:$0xff]   ;;  %v1830_v21 = vld [vmem:[#allocation4 + $0x40] ss:$8 sps:$4 sm:$0xff]   ;;  %v85_v4 = vlaneseq }
  0x3c   :  { %203 = vmatprep.subr.bf16.mxu1 %v1818_v9  ;;  %v1835_v22 = vld [vmem:[#allocation4 + $0x34] ss:$8 sps:$4 sm:$0xff]   ;;  %v1833_v23 = vld [vmem:[#allocation4 + $0x30] ss:$8 sps:$4 sm:$0xff]   ;;  %v1838_v24 = vld [vmem:[#allocation4 + $0x24] ss:$8 sps:$4 sm:$0xff]  }
  0x3d   :  { %v1836_v25 = vld [vmem:[#allocation4 + $0x20] ss:$8 sps:$4 sm:$0xff]   ;;  %v1841_v26 = vld [vmem:[#allocation4 + $0x14] ss:$8 sps:$4 sm:$0xff]   ;;  %v1839_v27 = vld [vmem:[#allocation4 + $0x10] ss:$8 sps:$4 sm:$0xff]  }
  0x3e   :  { %163 = vmatpush1.bf16.msra.mxu0 %v1815_v10  ;;  %v1844_v28 = vld [vmem:[#allocation4 + $0x4] ss:$8 sps:$4 sm:$0xff]   ;;  %v1842_v29 = vld [vmem:[#allocation4] ss:$8 sps:$4 sm:$0xff]   ;;  %v1847_v30 = vld [vmem:[#allocation4 + $0xf4] ss:$8 sps:$4 sm:$0xff]  }
  0x3f   :  { %438 = vmatprep.subr.bf16.mxu0 %v1823_v12  ;;  %204 = vmatpush1.bf16.msra.mxu1 %v1820_v13  ;;  %v1845_v31 = vld [vmem:[#allocation4 + $0xf0] ss:$8 sps:$4 sm:$0xff]   ;;  %v1850_v32 = vld [vmem:[#allocation4 + $0xe4] ss:$8 sps:$4 sm:$0xff]   ;;  %v1848_v33 = vld [vmem:[#allocation4 + $0xe0] ss:$8 sps:$4 sm:$0xff]  }
  0x40   :  { %v1853_v34 = vld [vmem:[#allocation4 + $0xd4] ss:$8 sps:$4 sm:$0xff]   ;;  %v1851_v35 = vld [vmem:[#allocation4 + $0xd0] ss:$8 sps:$4 sm:$0xff]   ;;  %v1856_v36 = vld [vmem:[#allocation4 + $0xc4] ss:$8 sps:$4 sm:$0xff]  }
  0x41   :  { %1591 = vmatmul.mubr.msk.bf16.vlgmr.msra.gmra.mxu0 %vm131_vm1, %v74_v14  ;;  %v1854_v37 = vld [vmem:[#allocation4 + $0xc0] ss:$8 sps:$4 sm:$0xff]   ;;  %v1859_v38 = vld [vmem:[#allocation4 + $0xb4] ss:$8 sps:$4 sm:$0xff]   ;;  %v1857_v39 = vld [vmem:[#allocation4 + $0xb0] ss:$8 sps:$4 sm:$0xff]  }
  0x42   :  { %439 = vmatpush1.bf16.msra.mxu0 %v1821_v15  ;;  %1593 = vmatmul.mubr.msk.bf16.vlgmr.msra.gmra.mxu1 %vm131_vm1, %v74_v14  ;;  %v1862_v40 = vld [vmem:[#allocation4 + $0xa4] ss:$8 sps:$4 sm:$0xff]   ;;  %v1860_v41 = vld [vmem:[#allocation4 + $0xa0] ss:$8 sps:$4 sm:$0xff]   ;;  %v1865_v42 = vld [vmem:[#allocation4 + $0x94] ss:$8 sps:$4 sm:$0xff]  }
  0x43   :  { %440 = vmatprep.subr.bf16.mxu0 %v1826_v16  ;;  %v1863_v43 = vld [vmem:[#allocation4 + $0x90] ss:$8 sps:$4 sm:$0xff]   ;;  %v1868_v44 = vld [vmem:[#allocation4 + $0x84] ss:$8 sps:$4 sm:$0xff]   ;;  %v1866_v45 = vld [vmem:[#allocation4 + $0x80] ss:$8 sps:$4 sm:$0xff]  }
  0x44   :  { %v1871_v46 = vld [vmem:[#allocation4 + $0x274] ss:$8 sps:$4 sm:$0xff]   ;;  %v1917_v47 = vld [vmem:[#allocation4 + $0x170] ss:$8 sps:$4 sm:$0xff]   ;;  %v1922_v49 = vld [vmem:[#allocation4 + $0x164] ss:$8 sps:$4 sm:$0xff]  }
  0x45   :  { %v1919_v48 = vld [vmem:[#allocation4 + $0x174] ss:$8 sps:$4 sm:$0xff]   ;;  %v1920_v50 = vld [vmem:[#allocation4 + $0x160] ss:$8 sps:$4 sm:$0xff]   ;;  %v1923_v52 = vld [vmem:[#allocation4 + $0x150] ss:$8 sps:$4 sm:$0xff]  }
  0x46   :  { %441 = vmatpush1.bf16.msra.mxu0 %v1824_v17  ;;  %684 = vmatprep.subr.bf16.mxu1 %v1919_v48  ;;  %v1925_v51 = vld [vmem:[#allocation4 + $0x154] ss:$8 sps:$4 sm:$0xff]   ;;  %v1928_v53 = vld [vmem:[#allocation4 + $0x144] ss:$8 sps:$4 sm:$0xff]   ;;  %v1926_v54 = vld [vmem:[#allocation4 + $0x140] ss:$8 sps:$4 sm:$0xff]  }
  0x47   :  { %442 = vmatprep.subr.bf16.mxu0 %v1829_v18  ;;  %685 = vmatpush1.bf16.msra.mxu1 %v1917_v47  ;;  %v1931_v55 = vld [vmem:[#allocation4 + $0x134] ss:$8 sps:$4 sm:$0xff]   ;;  %v1929_v56 = vld [vmem:[#allocation4 + $0x130] ss:$8 sps:$4 sm:$0xff]   ;;  %v1934_v57 = vld [vmem:[#allocation4 + $0x124] ss:$8 sps:$4 sm:$0xff]  }
  0x48   :  { %686 = vmatprep.subr.bf16.mxu1 %v1922_v49  ;;  %v1932_v58 = vld [vmem:[#allocation4 + $0x120] ss:$8 sps:$4 sm:$0xff]   ;;  %v1937_v59 = vld [vmem:[#allocation4 + $0x114] ss:$8 sps:$4 sm:$0xff]   ;;  %v1935_v60 = vld [vmem:[#allocation4 + $0x110] ss:$8 sps:$4 sm:$0xff]  }
  0x49   :  { %v1940_v61 = vld [vmem:[#allocation4 + $0x104] ss:$8 sps:$4 sm:$0xff]   ;;  %v1938_v62 = vld [vmem:[#allocation4 + $0x100] ss:$8 sps:$4 sm:$0xff]   ;;  %v1943_v63 = vld [vmem:[#allocation4 + $0x1f4] ss:$8 sps:$4 sm:$0xff]  }
  0x4a   :  { %443 = vmatpush1.bf16.msra.mxu0 %v1827_v19  ;;  %v1941_v0 = vld [vmem:[#allocation4 + $0x1f0] ss:$8 sps:$4 sm:$0xff]   ;;  %v1946_v1 = vld [vmem:[#allocation4 + $0x1e4] ss:$8 sps:$4 sm:$0xff]   ;;  %v1944_v2 = vld [vmem:[#allocation4 + $0x1e0] ss:$8 sps:$4 sm:$0xff]  }
  0x4b   :  { %444 = vmatprep.subr.bf16.mxu0 %v1832_v20  ;;  %687 = vmatpush1.bf16.msra.mxu1 %v1920_v50  ;;  %v1949_v3 = vld [vmem:[#allocation4 + $0x1d4] ss:$8 sps:$4 sm:$0xff]   ;;  %v1947_v5 = vld [vmem:[#allocation4 + $0x1d0] ss:$8 sps:$4 sm:$0xff]   ;;  %v1952_v6 = vld [vmem:[#allocation4 + $0x1c4] ss:$8 sps:$4 sm:$0xff]  }
  0x4c   :  { %688 = vmatprep.subr.bf16.mxu1 %v1925_v51  ;;  %v2188_v7 = vshrl.u32 %v85_v4, 7  ;;  %v1950_v8 = vld [vmem:[#allocation4 + $0x1c0] ss:$8 sps:$4 sm:$0xff]   ;;  %v1955_v9 = vld [vmem:[#allocation4 + $0x1b4] ss:$8 sps:$4 sm:$0xff]  }
  0x4d   :  { %v1953_v11 = vld [vmem:[#allocation4 + $0x1b0] ss:$8 sps:$4 sm:$0xff]   ;;  %v2193_v12 = vld [vmem:[#allocation7] sm:$0xff]  ;;  %v2195_v14 = vld [vmem:[#allocation7 + $0x8] sm:$0xff] }
  0x4e   :  { %445 = vmatpush1.bf16.msra.mxu0 %v1830_v21  ;;  %v2191_v10 = vsub.s32 0, %v2188_v7  ;;  %v1958_v13 = vld [vmem:[#allocation4 + $0x1a4] ss:$8 sps:$4 sm:$0xff]   ;;  %v1956_v16 = vld [vmem:[#allocation4 + $0x1a0] ss:$8 sps:$4 sm:$0xff]   ;;  %v78_v17 = vld [vmem:[#allocation7 + $0x18] sm:$0xff] }
  0x4f   :  { %446 = vmatprep.subr.bf16.mxu0 %v1835_v22  ;;  %689 = vmatpush1.bf16.msra.mxu1 %v1923_v52  ;;  %v1884_v47 = vld [vmem:[#allocation4 + $0x220] ss:$8 sps:$4 sm:$0xff]   ;;  %v1889_v48 = vld [vmem:[#allocation4 + $0x214] ss:$8 sps:$4 sm:$0xff]   ;;  %v1887_v49 = vld [vmem:[#allocation4 + $0x210] ss:$8 sps:$4 sm:$0xff]  }
  0x50   :  { %690 = vmatprep.subr.bf16.mxu1 %v1928_v53  ;;  %v88_v15 = vrot.slane %v2193_v12, %v2191_v10  ;;  %v92_v18 = vrot.slane %v2195_v14, %v2191_v10  ;;  %v100_v21 = vrot.slane %v78_v17, %v2191_v10  ;;  %v1892_v50 = vld [vmem:[#allocation4 + $0x204] ss:$8 sps:$4 sm:$0xff]   ;;  %v1890_v51 = vld [vmem:[#allocation4 + $0x200] ss:$8 sps:$4 sm:$0xff]   ;;  %v1895_v52 = vld [vmem:[#allocation4 + $0x2f4] ss:$8 sps:$4 sm:$0xff]  }
  0x51   :  { %v1893_v53 = vld [vmem:[#allocation4 + $0x2f0] ss:$8 sps:$4 sm:$0xff]  }
  0x52   :  { %447 = vmatpush1.bf16.msra.mxu0 %v1833_v23  ;;  %v2013_v17 = vld [vmem:[#allocation6 + $0x78] sm:$0xff]  }
  0x53   :  { %448 = vmatprep.subr.bf16.mxu0 %v1838_v24  ;;  %691 = vmatpush1.bf16.msra.mxu1 %v1926_v54  ;;  %v1898_v54 = vld [vmem:[#allocation4 + $0x2e4] ss:$8 sps:$4 sm:$0xff]  }
  0x54   :  { %692 = vmatprep.subr.bf16.mxu1 %v1931_v55  ;;  %v1896_v55 = vld [vmem:[#allocation4 + $0x2e0] ss:$8 sps:$4 sm:$0xff]  }
  0x56   :  { %449 = vmatpush1.bf16.msra.mxu0 %v1836_v25 }
  0x57   :  { %450 = vmatprep.subr.bf16.mxu0 %v1841_v26  ;;  %693 = vmatpush1.bf16.msra.mxu1 %v1929_v56  ;;  %v1901_v56 = vld [vmem:[#allocation4 + $0x2d4] ss:$8 sps:$4 sm:$0xff]  }
  0x58   :  { %694 = vmatprep.subr.bf16.mxu1 %v1934_v57  ;;  %v1899_v57 = vld [vmem:[#allocation4 + $0x2d0] ss:$8 sps:$4 sm:$0xff]  }
  0x5a   :  { %451 = vmatpush1.bf16.msra.mxu0 %v1839_v27 }
  0x5b   :  { %452 = vmatprep.subr.bf16.mxu0 %v1844_v28  ;;  %695 = vmatpush1.bf16.msra.mxu1 %v1932_v58  ;;  %v1904_v58 = vld [vmem:[#allocation4 + $0x2c4] ss:$8 sps:$4 sm:$0xff]  }
  0x5c   :  { %696 = vmatprep.subr.bf16.mxu1 %v1937_v59  ;;  %v1902_v59 = vld [vmem:[#allocation4 + $0x2c0] ss:$8 sps:$4 sm:$0xff]  }
  0x5e   :  { %453 = vmatpush1.bf16.msra.mxu0 %v1842_v29 }
  0x5f   :  { %454 = vmatprep.subr.bf16.mxu0 %v1847_v30  ;;  %697 = vmatpush1.bf16.msra.mxu1 %v1935_v60  ;;  %v1907_v60 = vld [vmem:[#allocation4 + $0x2b4] ss:$8 sps:$4 sm:$0xff]  }
  0x60   :  { %698 = vmatprep.subr.bf16.mxu1 %v1940_v61  ;;  %v1905_v61 = vld [vmem:[#allocation4 + $0x2b0] ss:$8 sps:$4 sm:$0xff]  }
  0x62   :  { %455 = vmatpush2.bf16.msra.mxu0 %v1845_v31 }
  0x63   :  { %456 = vmatprep.subr.bf16.mxu0 %v1850_v32  ;;  %699 = vmatpush1.bf16.msra.mxu1 %v1938_v62  ;;  %v1910_v62 = vld [vmem:[#allocation4 + $0x2a4] ss:$8 sps:$4 sm:$0xff]  }
  0x64   :  { %700 = vmatprep.subr.bf16.mxu1 %v1943_v63  ;;  %v77_v63 = vld [vmem:[#allocation7 + $0x10] sm:$0xff] }
  0x66   :  { %457 = vmatpush2.bf16.msra.mxu0 %v1848_v33  ;;  %v1869_v33 = vld [vmem:[#allocation4 + $0x270] ss:$8 sps:$4 sm:$0xff]  }
  0x67   :  { %458 = vmatprep.subr.bf16.mxu0 %v1853_v34  ;;  %701 = vmatpush2.bf16.msra.mxu1 %v1941_v0  ;;  %v1908_v0 = vld [vmem:[#allocation4 + $0x2a0] ss:$8 sps:$4 sm:$0xff]  }
  0x68   :  { %702 = vmatprep.subr.bf16.mxu1 %v1946_v1  ;;  %v96_v1 = vrot.slane %v77_v63, %v2191_v10  ;;  %v1964_v10 = vld [vmem:[#allocation4 + $0x184] ss:$8 sps:$4 sm:$0xff]  }
  0x69   :  { %v2000_v63 = vld [vmem:[#allocation4 + $0x3c4] ss:$8 sps:$4 sm:$0xff]  }
  0x6a   :  { %459 = vmatpush2.bf16.msra.mxu0 %v1851_v35 }
  0x6b   :  { %460 = vmatprep.subr.bf16.mxu0 %v1856_v36  ;;  %703 = vmatpush2.bf16.msra.mxu1 %v1944_v2  ;;  %v1874_v36 = vld [vmem:[#allocation4 + $0x264] ss:$8 sps:$4 sm:$0xff]   ;;  %v1913_v2 = vld [vmem:[#allocation4 + $0x294] ss:$8 sps:$4 sm:$0xff]  }
  0x6c   :  { %704 = vmatprep.subr.bf16.mxu1 %v1949_v3  ;;  %v1911_v3 = vld [vmem:[#allocation4 + $0x290] ss:$8 sps:$4 sm:$0xff]  }
  0x6e   :  { %461 = vmatpush2.bf16.msra.mxu0 %v1854_v37 }
  0x6f   :  { %462 = vmatprep.subr.bf16.mxu0 %v1859_v38  ;;  %705 = vmatpush2.bf16.msra.mxu1 %v1947_v5  ;;  %v1916_v5 = vld [vmem:[#allocation4 + $0x284] ss:$8 sps:$4 sm:$0xff]  }
  0x70   :  { %706 = vmatprep.subr.bf16.mxu1 %v1952_v6  ;;  %v1914_v6 = vld [vmem:[#allocation4 + $0x280] ss:$8 sps:$4 sm:$0xff]  }
  0x72   :  { %463 = vmatpush2.bf16.msra.mxu0 %v1857_v39  ;;  %v1872_v39 = vld [vmem:[#allocation4 + $0x260] ss:$8 sps:$4 sm:$0xff]  }
  0x73   :  { %464 = vmatprep.subr.bf16.mxu0 %v1862_v40  ;;  %707 = vmatpush2.bf16.msra.mxu1 %v1950_v8  ;;  %v1877_v40 = vld [vmem:[#allocation4 + $0x254] ss:$8 sps:$4 sm:$0xff]  }
  0x74   :  { %708 = vmatprep.subr.bf16.mxu1 %v1955_v9 }
  0x76   :  { %465 = vmatpush2.bf16.msra.mxu0 %v1860_v41  ;;  %v1875_v41 = vld [vmem:[#allocation4 + $0x250] ss:$8 sps:$4 sm:$0xff]  }
  0x77   :  { %466 = vmatprep.subr.bf16.mxu0 %v1865_v42  ;;  %709 = vmatpush2.bf16.msra.mxu1 %v1953_v11  ;;  %v1880_v42 = vld [vmem:[#allocation4 + $0x244] ss:$8 sps:$4 sm:$0xff]   ;;  %v1961_v11 = vld [vmem:[#allocation4 + $0x194] ss:$8 sps:$4 sm:$0xff]  }
  0x78   :  { %710 = vmatprep.subr.bf16.mxu1 %v1958_v13  ;;  %v1959_v13 = vld [vmem:[#allocation4 + $0x190] ss:$8 sps:$4 sm:$0xff]  }
  0x7a   :  { %467 = vmatpush2.bf16.msra.mxu0 %v1863_v43  ;;  %v1878_v43 = vld [vmem:[#allocation4 + $0x240] ss:$8 sps:$4 sm:$0xff]  }
  0x7b   :  { %468 = vmatprep.subr.bf16.mxu0 %v1868_v44  ;;  %711 = vmatpush2.bf16.msra.mxu1 %v1956_v16  ;;  %v1883_v44 = vld [vmem:[#allocation4 + $0x234] ss:$8 sps:$4 sm:$0xff]  }
  0x7c   :  { %712 = vmatprep.subr.bf16.mxu1 %v1961_v11  ;;  %v1967_v16 = vld [vmem:[#allocation4 + $0x374] ss:$8 sps:$4 sm:$0xff]   ;;  %v2007_v11 = vld [vmem:[#allocation4 + $0x390] ss:$8 sps:$4 sm:$0xff]  }
  0x7e   :  { %469 = vmatpush2.bf16.msra.mxu0 %v1866_v45  ;;  %v1881_v45 = vld [vmem:[#allocation4 + $0x230] ss:$8 sps:$4 sm:$0xff]  }
  0x7f   :  { %930 = vmatprep.subr.bf16.mxu0 %v1871_v46  ;;  %v1886_v46 = vld [vmem:[#allocation4 + $0x224] ss:$8 sps:$4 sm:$0xff]   ;;  %713 = vmatpush2.bf16.msra.mxu1 %v1959_v13 }
  0x80   :  { %714 = vmatprep.subr.bf16.mxu1 %v1964_v10  ;;  %v2012_v10 = vld [vmem:[#allocation4 + $0x384] ss:$8 sps:$4 sm:$0xff]  }
 0x101   :  { %v182_v19 = vpop.f32.mrf.mxu0 }
 0x102   :  { %v183_v20 = vadd.f32 %v182_v19, %v88_v15  ;;  %v2202_v23 = vpop.f32.mrf.mxu1  ;;  %v1962_v15 = vld [vmem:[#allocation4 + $0x180] ss:$8 sps:$4 sm:$0xff]   ;;  %v2015_v19 = vld [vmem:[#allocation6 + $0x70] sm:$0xff]  }
 0x103   :  { %v184_v22 = vpop.f32.mrf.mxu0  ;;  %v224_v4 = vadd.f32 %v2202_v23, %v96_v1  ;;  %715 = vmatpush2.bf16.msra.mxu1 %v1962_v15  ;;  %v2019_v23 = vld [vmem:[#allocation6 + $0x60] sm:$0xff]   ;;  %v2003_v1 = vld [vmem:[#allocation4 + $0x3b4] ss:$8 sps:$4 sm:$0xff]  }
 0x104   :  { %v185_v24 = vadd.f32 %v184_v22, %v92_v18  ;;  %v230_v25 = vmax.f32 %v183_v20, 0.0  ;;  %v225_v27 = vpop.f32.mrf.mxu1  ;;  %1176 = vmatprep.subr.bf16.mxu1 %v1967_v16  ;;  %v2014_v18 = vld [vmem:[#allocation6 + $0x38] sm:$0xff]   ;;  %v2016_v20 = vld [vmem:[#allocation6 + $0x30] sm:$0xff]   ;;  %v2018_v22 = vld [vmem:[#allocation6 + $0x28] sm:$0xff]  }
 0x105   :  { %v186_v26 = vpop.f32.mrf.mxu0  ;;  %v226_v29 = vadd.f32 %v225_v27, %v100_v21  ;;  %v232_v8 = vmax.f32 %v224_v4, 0.0  ;;  %v2017_v21 = vld [vmem:[#allocation6 + $0x68] sm:$0xff]   ;;  %v2023_v27 = vld [vmem:[#allocation6 + $0x50] sm:$0xff]   ;;  %v764_v4 = vsub.s32 3, %v2188_v7 }
 0x106   :  { %v231_v28 = vmax.f32 %v185_v24, 0.0  ;;  %v227_v31 = vpop.f32.mrf.mxu1  ;;  %v234_v35 = vpack.c.bf16 %v230_v25, %v230_v25  ;;  %v2020_v24 = vld [vmem:[#allocation6 + $0x20] sm:$0xff]   ;;  %v2021_v25 = vld [vmem:[#allocation6 + $0x58] sm:$0xff]  }
 0x107   :  { %v187_v30 = vpop.f32.mrf.mxu0  ;;  %v233_v34 = vmax.f32 %v226_v29, 0.0  ;;  %v236_v9 = vpack.c.bf16 %v232_v8, %v232_v8  ;;  %v2022_v26 = vld [vmem:[#allocation6 + $0x18] sm:$0xff]   ;;  %v272_v29 = vsub.s32 1, %v2188_v7  ;;  %v765_v8 = vrot.slane %v2193_v12, %v764_v4 }
 0x108   :  { %v235_v32 = vpack.c.bf16 %v231_v28, %v231_v28  ;;  %v228_v37 = vpop.f32.mrf.mxu1  ;;  %v2024_v28 = vld [vmem:[#allocation6 + $0x10] sm:$0xff]  }
 0x109   :  { %v237_v38 = vpack.c.bf16 %v233_v34, %v233_v34  ;;  %v273_v30 = vrot.slane %v2193_v12, %v272_v29  ;;  %v277_v31 = vrot.slane %v2195_v14, %v272_v29  ;;  %v2029_v29 = vld [vmem:[#allocation6 + $0xf8] sm:$0xff]  }
 0x10a   :  { %470 = vmatprep.mubr.bf16.mxu0 %v235_v32 }
 0x10b   :  { %471 = vmatmul.mubr.bf16.vlgmr.msra.gmra.mxu0 %v234_v35 }
 0x10c   :  { %931 = vmatpush1.bf16.msra.mxu0 %v1869_v33  ;;  %962 = vmatprep.mubr.bf16.mxu0 %v237_v38 }
 0x10d   :  { %932 = vmatprep.subr.bf16.mxu0 %v1874_v36 }
 0x110   :  { %933 = vmatpush1.bf16.msra.mxu0 %v1872_v39 }
 0x111   :  { %934 = vmatprep.subr.bf16.mxu0 %v1877_v40 }
 0x114   :  { %935 = vmatpush1.bf16.msra.mxu0 %v1875_v41  ;;  %v1965_v41 = vld [vmem:[#allocation4 + $0x370] ss:$8 sps:$4 sm:$0xff]  }
 0x115   :  { %936 = vmatprep.subr.bf16.mxu0 %v1880_v42 }
 0x118   :  { %937 = vmatpush1.bf16.msra.mxu0 %v1878_v43  ;;  %v1970_v43 = vld [vmem:[#allocation4 + $0x364] ss:$8 sps:$4 sm:$0xff]  }
 0x119   :  { %938 = vmatprep.subr.bf16.mxu0 %v1883_v44  ;;  %v1968_v44 = vld [vmem:[#allocation4 + $0x360] ss:$8 sps:$4 sm:$0xff]  }
 0x11c   :  { %939 = vmatpush1.bf16.msra.mxu0 %v1881_v45  ;;  %v1973_v45 = vld [vmem:[#allocation4 + $0x354] ss:$8 sps:$4 sm:$0xff]  }
 0x11d   :  { %940 = vmatprep.subr.bf16.mxu0 %v1886_v46  ;;  %v1971_v46 = vld [vmem:[#allocation4 + $0x350] ss:$8 sps:$4 sm:$0xff]  }
 0x120   :  { %941 = vmatpush1.bf16.msra.mxu0 %v1884_v47  ;;  %v1976_v47 = vld [vmem:[#allocation4 + $0x344] ss:$8 sps:$4 sm:$0xff]  }
 0x121   :  { %942 = vmatprep.subr.bf16.mxu0 %v1889_v48  ;;  %v1974_v48 = vld [vmem:[#allocation4 + $0x340] ss:$8 sps:$4 sm:$0xff]  }
 0x124   :  { %943 = vmatpush1.bf16.msra.mxu0 %v1887_v49  ;;  %v1979_v49 = vld [vmem:[#allocation4 + $0x334] ss:$8 sps:$4 sm:$0xff]  }
 0x125   :  { %944 = vmatprep.subr.bf16.mxu0 %v1892_v50  ;;  %v1977_v50 = vld [vmem:[#allocation4 + $0x330] ss:$8 sps:$4 sm:$0xff]  }
 0x128   :  { %945 = vmatpush1.bf16.msra.mxu0 %v1890_v51  ;;  %v1982_v51 = vld [vmem:[#allocation4 + $0x324] ss:$8 sps:$4 sm:$0xff]  }
 0x129   :  { %946 = vmatprep.subr.bf16.mxu0 %v1895_v52  ;;  %v1980_v52 = vld [vmem:[#allocation4 + $0x320] ss:$8 sps:$4 sm:$0xff]  }
 0x12c   :  { %947 = vmatpush2.bf16.msra.mxu0 %v1893_v53  ;;  %v1985_v53 = vld [vmem:[#allocation4 + $0x314] ss:$8 sps:$4 sm:$0xff]  }
 0x12d   :  { %948 = vmatprep.subr.bf16.mxu0 %v1898_v54  ;;  %v1983_v54 = vld [vmem:[#allocation4 + $0x310] ss:$8 sps:$4 sm:$0xff]  }
 0x130   :  { %949 = vmatpush2.bf16.msra.mxu0 %v1896_v55  ;;  %v1988_v55 = vld [vmem:[#allocation4 + $0x304] ss:$8 sps:$4 sm:$0xff]  }
 0x131   :  { %950 = vmatprep.subr.bf16.mxu0 %v1901_v56  ;;  %v1986_v56 = vld [vmem:[#allocation4 + $0x300] ss:$8 sps:$4 sm:$0xff]  }
 0x134   :  { %951 = vmatpush2.bf16.msra.mxu0 %v1899_v57  ;;  %v1991_v57 = vld [vmem:[#allocation4 + $0x3f4] ss:$8 sps:$4 sm:$0xff]  }
 0x135   :  { %952 = vmatprep.subr.bf16.mxu0 %v1904_v58  ;;  %v1989_v58 = vld [vmem:[#allocation4 + $0x3f0] ss:$8 sps:$4 sm:$0xff]  }
 0x138   :  { %953 = vmatpush2.bf16.msra.mxu0 %v1902_v59  ;;  %v1994_v59 = vld [vmem:[#allocation4 + $0x3e4] ss:$8 sps:$4 sm:$0xff]  }
 0x139   :  { %954 = vmatprep.subr.bf16.mxu0 %v1907_v60  ;;  %v1992_v60 = vld [vmem:[#allocation4 + $0x3e0] ss:$8 sps:$4 sm:$0xff]  }
 0x13c   :  { %955 = vmatpush2.bf16.msra.mxu0 %v1905_v61  ;;  %v1997_v61 = vld [vmem:[#allocation4 + $0x3d4] ss:$8 sps:$4 sm:$0xff]  }
 0x13d   :  { %956 = vmatprep.subr.bf16.mxu0 %v1910_v62  ;;  %v1995_v62 = vld [vmem:[#allocation4 + $0x3d0] ss:$8 sps:$4 sm:$0xff]  }
 0x140   :  { %957 = vmatpush2.bf16.msra.mxu0 %v1908_v0  ;;  %v1998_v0 = vld [vmem:[#allocation4 + $0x3c0] ss:$8 sps:$4 sm:$0xff]  }
 0x141   :  { %958 = vmatprep.subr.bf16.mxu0 %v1913_v2  ;;  %v2001_v2 = vld [vmem:[#allocation4 + $0x3b0] ss:$8 sps:$4 sm:$0xff]  }
 0x144   :  { %959 = vmatpush2.bf16.msra.mxu0 %v1911_v3  ;;  %v2006_v3 = vld [vmem:[#allocation4 + $0x3a4] ss:$8 sps:$4 sm:$0xff]  }
 0x145   :  { %960 = vmatprep.subr.bf16.mxu0 %v1916_v5  ;;  %v2004_v5 = vld [vmem:[#allocation4 + $0x3a0] ss:$8 sps:$4 sm:$0xff]  }
 0x148   :  { %961 = vmatpush2.bf16.msra.mxu0 %v1914_v6  ;;  %v2009_v6 = vld [vmem:[#allocation4 + $0x394] ss:$8 sps:$4 sm:$0xff]  }
 0x149   :  { %1754 = vmatprep.subr.bf16.mxu0 %v2013_v17 }
 0x14b   :  { %963 = vmatmul.mubr.bf16.vlgmr.msra.gmra.mxu0 %v236_v9  ;;  %v769_v9 = vrot.slane %v2195_v14, %v764_v4 }
 0x14c   :  { %1755 = vmatpush3.bf16.msra.mxu0 %v2014_v18  ;;  %v2010_v18 = vld [vmem:[#allocation4 + $0x380] ss:$8 sps:$4 sm:$0xff]  }
 0x14d   :  { %1756 = vmatprep.subr.bf16.mxu0 %v2015_v19 }
 0x150   :  { %1757 = vmatpush3.bf16.msra.mxu0 %v2016_v20 }
 0x151   :  { %1758 = vmatprep.subr.bf16.mxu0 %v2017_v21 }
 0x154   :  { %1759 = vmatpush3.bf16.msra.mxu0 %v2018_v22 }
 0x155   :  { %1760 = vmatprep.subr.bf16.mxu0 %v2019_v23 }
 0x158   :  { %1761 = vmatpush3.bf16.msra.mxu0 %v2020_v24 }
 0x159   :  { %1762 = vmatprep.subr.bf16.mxu0 %v2021_v25  ;;  %v2025_v25 = vld [vmem:[#allocation6 + $0x48] sm:$0xff]  }
 0x15c   :  { %1763 = vmatpush3.bf16.msra.mxu0 %v2022_v26  ;;  %v2026_v26 = vld [vmem:[#allocation6 + $0x8] sm:$0xff]  }
 0x15d   :  { %1764 = vmatprep.subr.bf16.mxu0 %v2023_v27  ;;  %v2027_v27 = vld [vmem:[#allocation6 + $0x40] sm:$0xff]  }
 0x160   :  { %1765 = vmatpush3.bf16.msra.mxu0 %v2024_v28  ;;  %v2028_v28 = vld [vmem:[#allocation6] sm:$0xff]  }
 0x161   :  { %1766 = vmatprep.subr.bf16.mxu0 %v2025_v25 }
 0x164   :  { %1767 = vmatpush3.bf16.msra.mxu0 %v2026_v26 }
 0x165   :  { %1768 = vmatprep.subr.bf16.mxu0 %v2027_v27 }
 0x168   :  { %1769 = vmatpush3.bf16.msra.mxu0 %v2028_v28 }
 0x1cb   :  { %v472_v32 = vpop.f32.mrf.mxu0 }
 0x1cc   :  { %v473_v33 = vadd.f32 %v472_v32, %v273_v30  ;;  %v2030_v30 = vld [vmem:[#allocation6 + $0xb8] sm:$0xff]   ;;  %v2032_v32 = vld [vmem:[#allocation6 + $0xb0] sm:$0xff]  }
 0x1cd   :  { %v474_v34 = vpop.f32.mrf.mxu0 }
 0x1ce   :  { %v475_v35 = vadd.f32 %v474_v34, %v277_v31  ;;  %v479_v36 = vmax.f32 %v473_v33, 0.0  ;;  %v2031_v31 = vld [vmem:[#allocation6 + $0xf0] sm:$0xff]   ;;  %v2033_v33 = vld [vmem:[#allocation6 + $0xe8] sm:$0xff]  }
 0x1cf   :  { %v476_v37 = vpop.f32.mrf.mxu0  ;;  %v2034_v34 = vld [vmem:[#allocation6 + $0xa8] sm:$0xff]  }
 0x1d0   :  { %v480_v38 = vmax.f32 %v475_v35, 0.0  ;;  %v481_v42 = vpack.c.bf16 %v479_v36, %v479_v36  ;;  %v2035_v35 = vld [vmem:[#allocation6 + $0xe0] sm:$0xff]   ;;  %v2037_v37 = vld [vmem:[#allocation6 + $0xd8] sm:$0xff]  }
 0x1d1   :  { %v477_v39 = vpop.f32.mrf.mxu0  ;;  %v2036_v36 = vld [vmem:[#allocation6 + $0xa0] sm:$0xff]  }
 0x1d2   :  { %v482_v40 = vpack.c.bf16 %v480_v38, %v480_v38  ;;  %v2038_v38 = vld [vmem:[#allocation6 + $0x98] sm:$0xff]   ;;  %v2039_v39 = vld [vmem:[#allocation6 + $0xd0] sm:$0xff]  }
 0x1d4   :  { %716 = vmatprep.mubr.bf16.mxu1 %v482_v40  ;;  %v2040_v40 = vld [vmem:[#allocation6 + $0x90] sm:$0xff]  }
 0x1d5   :  { %717 = vmatmul.mubr.bf16.vlgmr.msra.gmra.mxu1 %v481_v42  ;;  %v2042_v42 = vld [vmem:[#allocation6 + $0x88] sm:$0xff]  }
 0x1d6   :  { %1177 = vmatpush1.bf16.msra.mxu1 %v1965_v41  ;;  %v2041_v41 = vld [vmem:[#allocation6 + $0xc8] sm:$0xff]  }
 0x1d7   :  { %1178 = vmatprep.subr.bf16.mxu1 %v1970_v43  ;;  %v2043_v43 = vld [vmem:[#allocation6 + $0xc0] sm:$0xff]  }
 0x1da   :  { %1179 = vmatpush1.bf16.msra.mxu1 %v1968_v44  ;;  %v2044_v44 = vld [vmem:[#allocation6 + $0x80] sm:$0xff]  }
 0x1db   :  { %1180 = vmatprep.subr.bf16.mxu1 %v1973_v45  ;;  %v518_v45 = vsub.s32 2, %v2188_v7 }
 0x1de   :  { %1181 = vmatpush1.bf16.msra.mxu1 %v1971_v46  ;;  %v519_v46 = vrot.slane %v2193_v12, %v518_v45 }
 0x1df   :  { %1182 = vmatprep.subr.bf16.mxu1 %v1976_v47  ;;  %v523_v47 = vrot.slane %v2195_v14, %v518_v45 }
 0x1e2   :  { %1183 = vmatpush1.bf16.msra.mxu1 %v1974_v48 }
 0x1e3   :  { %1184 = vmatprep.subr.bf16.mxu1 %v1979_v49 }
 0x1e6   :  { %1185 = vmatpush1.bf16.msra.mxu1 %v1977_v50 }
 0x1e7   :  { %1186 = vmatprep.subr.bf16.mxu1 %v1982_v51 }
 0x1ea   :  { %1187 = vmatpush1.bf16.msra.mxu1 %v1980_v52 }
 0x1eb   :  { %1188 = vmatprep.subr.bf16.mxu1 %v1985_v53 }
 0x1ee   :  { %1189 = vmatpush1.bf16.msra.mxu1 %v1983_v54 }
 0x1ef   :  { %1190 = vmatprep.subr.bf16.mxu1 %v1988_v55 }
 0x1f2   :  { %1191 = vmatpush1.bf16.msra.mxu1 %v1986_v56 }
 0x1f3   :  { %1192 = vmatprep.subr.bf16.mxu1 %v1991_v57 }
 0x1f6   :  { %1193 = vmatpush2.bf16.msra.mxu1 %v1989_v58  ;;  %v1010_v58 = vsub.s32 4, %v2188_v7 }
 0x1f7   :  { %1194 = vmatprep.subr.bf16.mxu1 %v1994_v59 }
 0x1f8   :  { %v1011_v59 = vrot.slane %v2193_v12, %v1010_v58 }
 0x1fa   :  { %1195 = vmatpush2.bf16.msra.mxu1 %v1992_v60  ;;  %v1015_v60 = vrot.slane %v2195_v14, %v1010_v58  ;;  %v1287_v14 = vsub.s32 5, %v2188_v7 }
 0x1fb   :  { %1196 = vmatprep.subr.bf16.mxu1 %v1997_v61 }
 0x1fe   :  { %1197 = vmatpush2.bf16.msra.mxu1 %v1995_v62 }
 0x1ff   :  { %1198 = vmatprep.subr.bf16.mxu1 %v2000_v63 }
 0x202   :  { %1199 = vmatpush2.bf16.msra.mxu1 %v1998_v0 }
 0x203   :  { %1200 = vmatprep.subr.bf16.mxu1 %v2003_v1 }
 0x206   :  { %1201 = vmatpush2.bf16.msra.mxu1 %v2001_v2 }
 0x207   :  { %1202 = vmatprep.subr.bf16.mxu1 %v2006_v3 }
 0x20a   :  { %1203 = vmatpush2.bf16.msra.mxu1 %v2004_v5 }
 0x20b   :  { %v964_v13 = vpop.f32.mrf.mxu0  ;;  %1204 = vmatprep.subr.bf16.mxu1 %v2009_v6 }
 0x20c   :  { %v965_v15 = vadd.f32 %v964_v13, %v765_v8  ;;  %v2142_v8 = vmov 2  }
 0x20d   :  { %v966_v16 = vpop.f32.mrf.mxu0  ;;  %1810 = vset.pattern.permute.xlu0 %v2142_v8 }
 0x20e   :  { %v967_v17 = vadd.f32 %v966_v16, %v769_v9  ;;  %1205 = vmatpush2.bf16.msra.mxu1 %v2007_v11  ;;  %v971_v19 = vmax.f32 %v965_v15, 0.0  ;;  %v1288_v15 = vrot.slane %v2193_v12, %v1287_v14 }
 0x20f   :  { %v968_v20 = vpop.f32.mrf.mxu0  ;;  %1206 = vmatprep.subr.bf16.mxu1 %v2012_v10 }
 0x210   :  { %v972_v21 = vmax.f32 %v967_v17, 0.0  ;;  %v973_v24 = vpack.c.bf16 %v971_v19, %v971_v19 }
 0x211   :  { %v969_v22 = vpop.f32.mrf.mxu0 }
 0x212   :  { %v974_v23 = vpack.c.bf16 %v972_v21, %v972_v21  ;;  %1207 = vmatpush2.bf16.msra.mxu1 %v2010_v18 }
 0x213   :  { %1776 = vmatprep.subr.bf16.mxu1 %v2029_v29 }
 0x214   :  { %1208 = vmatprep.mubr.bf16.mxu1 %v974_v23 }
 0x215   :  { %1209 = vmatmul.mubr.bf16.vlgmr.msra.gmra.mxu1 %v973_v24 }
 0x216   :  { %1777 = vmatpush3.bf16.msra.mxu1 %v2030_v30 }
 0x217   :  { %1778 = vmatprep.subr.bf16.mxu1 %v2031_v31 }
 0x21a   :  { %1779 = vmatpush3.bf16.msra.mxu1 %v2032_v32 }
 0x21b   :  { %1780 = vmatprep.subr.bf16.mxu1 %v2033_v33 }
 0x21e   :  { %1781 = vmatpush3.bf16.msra.mxu1 %v2034_v34 }
 0x21f   :  { %1782 = vmatprep.subr.bf16.mxu1 %v2035_v35 }
 0x222   :  { %1783 = vmatpush3.bf16.msra.mxu1 %v2036_v36 }
 0x223   :  { %1784 = vmatprep.subr.bf16.mxu1 %v2037_v37 }
 0x226   :  { %1785 = vmatpush3.bf16.msra.mxu1 %v2038_v38 }
 0x227   :  { %1786 = vmatprep.subr.bf16.mxu1 %v2039_v39 }
 0x22a   :  { %1787 = vmatpush3.bf16.msra.mxu1 %v2040_v40 }
 0x22b   :  { %1788 = vmatprep.subr.bf16.mxu1 %v2041_v41 }
 0x22e   :  { %1789 = vmatpush3.bf16.msra.mxu1 %v2042_v42 }
 0x22f   :  { %1790 = vmatprep.subr.bf16.mxu1 %v2043_v43 }
 0x232   :  { %1791 = vmatpush3.bf16.msra.mxu1 %v2044_v44 }
 0x295   :  { %v718_v48 = vpop.f32.mrf.mxu1 }
 0x296   :  { %v719_v49 = vadd.f32 %v718_v48, %v519_v46 }
 0x297   :  { %v720_v50 = vpop.f32.mrf.mxu1 }
 0x298   :  { %v721_v51 = vadd.f32 %v720_v50, %v523_v47  ;;  %v725_v52 = vmax.f32 %v719_v49, 0.0 }
 0x299   :  { %v722_v53 = vpop.f32.mrf.mxu1 }
 0x29a   :  { %v726_v54 = vmax.f32 %v721_v51, 0.0  ;;  %v727_v57 = vpack.c.bf16 %v725_v52, %v725_v52 }
 0x29b   :  { %v723_v55 = vpop.f32.mrf.mxu1 }
 0x29c   :  { %v728_v56 = vpack.c.bf16 %v726_v54, %v726_v54 }
 0x29e   :  { %1513 = vmatprep.mubr.bf16.mxu0 %v728_v56 }
 0x29f   :  { %1514 = vmatmul.mubr.bf16.vlgmr.msra.gmra.mxu0 %v727_v57 }
 0x2d5   :  { %v1210_v61 = vpop.f32.mrf.mxu1 }
 0x2d6   :  { %v1211_v62 = vadd.f32 %v1210_v61, %v1011_v59 }
 0x2d7   :  { %v1212_v63 = vpop.f32.mrf.mxu1 }
 0x2d8   :  { %v1213_v0 = vadd.f32 %v1212_v63, %v1015_v60  ;;  %v1217_v1 = vmax.f32 %v1211_v62, 0.0 }
 0x2d9   :  { %v1214_v2 = vpop.f32.mrf.mxu1 }
 0x2da   :  { %v1218_v3 = vmax.f32 %v1213_v0, 0.0  ;;  %v1219_v6 = vpack.c.bf16 %v1217_v1, %v1217_v1 }
 0x2db   :  { %v1215_v4 = vpop.f32.mrf.mxu1 }
 0x2dc   :  { %v1220_v5 = vpack.c.bf16 %v1218_v3, %v1218_v3 }
 0x2de   :  { %1553 = vmatprep.mubr.bf16.mxu1 %v1220_v5 }
 0x2df   :  { %1554 = vmatmul.mubr.bf16.vlgmr.msra.gmra.mxu1 %v1219_v6 }
 0x35f   :  { %v1770_v9 = vpop.f32.mrf.mxu0 }
 0x361   :  { %v1771_v11 = vpop.f32.mrf.mxu0 }
 0x362   :  { %v1772_v16 = vadd.f32 %v1771_v11, %v1770_v9 }
 0x363   :  { %v1773_v13 = vpop.f32.mrf.mxu0 }
 0x364   :  { %v1516_v19 = vadd.f32 %v1772_v16, %v1288_v15 }
 0x365   :  { %v1774_v10 = vpop.f32.mrf.mxu0 }
 0x39f   :  { %v1792_v17 = vpop.f32.mrf.mxu1 }
 0x3a1   :  { %v1793_v18 = vpop.f32.mrf.mxu1 }
 0x3a2   :  { %v1794_v20 = vadd.f32 %v1793_v18, %v1792_v17 }
 0x3a3   :  { %v1795_v21 = vpop.f32.mrf.mxu1 }
 0x3a4   :  { %v1556_v22 = vadd.f32 %v1794_v20, %v1516_v19 }
 0x3a5   :  { %v1796_v23 = vpop.f32.mrf.mxu1 }
 0x3a6   :  { %v1562_v24 = vsel %vm1561_vm2, %v1556_v22, 0.0 }
 0x3a7   :  { %1563 = vadd.xlane.f32.xlu0 %v1562_v24 }
 0x3bd   :  { %1570 = vperm.xlu0 %1810, %v1556_v22  }
 0x430   :  { %v1564_v25 = vpop.xlane.xlu0 %1563 }
 0x431   :  { %v1566_v26 = vmul.f32 0.5, %v1564_v25 }
 0x433   :  { %v1567_v27 = vsub.f32 %v1556_v22, %v1566_v26 }
 0x438   :  { %v1571_v28 = vpop.permute.xlu0 %1570 }
 0x439   :  { %v1573_v29 = vadd.f32 %v1571_v28, %v1567_v27 }
 0x43b   :  { %1574 = vst.msk [vmem:[%s2228_s5] sm:$0xff] %vm1561_vm2, %v1573_v29 }
 0x43c   :  { %1579 = vsyncpa [#allocation3], 1 }
 0x43d   :  { %1580 = vsyncpa [#allocation5], 1 }
 0x43e   :  { %1581 = vsyncpa [#allocation8], 1 }

</bundles_post_ra>
